<compile_context>
chip_gen: v7x
topology: tpu7x:2x2x1
jax: 0.10.0
libtpu: 0.0.40
codegen_flags: <defaults>
</compile_context>

<pallas_src>
import functools
import math

import jax
import jax.numpy as jnp
from jax.experimental import pallas as pl
from jax.experimental.pallas import tpu as pltpu


# ---------------------------------------------------------------------------
# Pallas kernels: only the weight-sized work.
#   x_ref : (B, TK)   matmul LHS tile (delayed row if B==1, raw batch otherwise)
#   w_ref : (TK, TN)  transposed-weight tile W_t[i, o]
#   a_ref : (TK, 1)   lr * A_plus  * x_trace_new   (column vector)
#   b_ref : (1, TN)   post_spikes last row         (row vector)
#   c_ref : (TK, 1)   lr * A_minus * pre_last      (column vector)
#   d_ref : (1, TN)   y_trace_new                  (row vector)
# Grid: (j over N_out tiles ["parallel"], k over N_in tiles ["arbitrary"]).
# The synaptic current uses the OLD weight (w_ref is read before w_out_ref is
# written), exactly as in the PyTorch reference.
# ---------------------------------------------------------------------------
def _fwd_update_kernel(x_ref, w_ref, a_ref, b_ref, c_ref, d_ref,
                       cur_ref, w_out_ref, *, w_min, w_max):
    k = pl.program_id(1)

    @pl.when(k == 0)
    def _init():
        cur_ref[...] = jnp.zeros_like(cur_ref)

    # current += x @ W_t   (MXU, accumulated over the K grid axis; f32 output
    # block stays resident across k, so we accumulate directly into it)
    cur_ref[...] += jnp.dot(x_ref[...], w_ref[...],
                            preferred_element_type=jnp.float32)

    # Fused rank-2 STDP update on the VPU (no contraction-depth-1 matmuls):
    #   W_t <- clip(W_t + a (*) b - c (*) d, w_min, w_max)
    w_out_ref[...] = jnp.clip(
        w_ref[...] + a_ref[...] * b_ref[...] - c_ref[...] * d_ref[...],
        w_min, w_max)


def _fwd_kernel(x_ref, w_ref, cur_ref):
    k = pl.program_id(1)

    @pl.when(k == 0)
    def _init():
        cur_ref[...] = jnp.zeros_like(cur_ref)

    cur_ref[...] += jnp.dot(x_ref[...], w_ref[...],
                            preferred_element_type=jnp.float32)


# ---------------------------------------------------------------------------
# Small helpers (wrapper side)
# ---------------------------------------------------------------------------
def _round_up(x, m):
    return -(-x // m) * m


def _pad2(x, rows, cols):
    pr, pc = rows - x.shape[0], cols - x.shape[1]
    if pr == 0 and pc == 0:
        return x
    return jnp.pad(x, ((0, pr), (0, pc)))


def compute_delay_idx(delay, delay_max):
    """Per-input-column buffer row index from the learnable delay matrix.

    Matches the reference literally: row = clamp(round(mean(delay[:, i])) - 1,
    0, delay_max - 1), indexing the rolled buffer whose newest row is D-1.
    Recompute only if `delay` changes; the forward never modifies it.
    """
    dmean = jnp.round(jnp.mean(delay, axis=0, keepdims=True))        # (1, N_in)
    return jnp.clip(dmean.astype(jnp.int32) - 1, 0, delay_max - 1)


# ---------------------------------------------------------------------------
# Functional forward (wrapper around the Pallas kernel)
# ---------------------------------------------------------------------------
def stdp_forward(state, pre_spikes, post_spikes=None, learning=True, *, hp):
    """Functional STDPSynapse.forward.

    state = dict(weight_t, delay, delay_idx, spike_buffer, x_trace, y_trace)
    where weight_t is the (N_in, N_out) transposed view of the module weight.
    Returns (synaptic_current, new_state).
    """
    if pre_spikes.ndim == 1:
        pre_spikes = pre_spikes[None, :]
    pre_spikes = pre_spikes.astype(jnp.float32)
    B, n_in = pre_spikes.shape
    wt = state["weight_t"]                                    # (n_in, n_out)
    n_out = wt.shape[1]

    pre_last = pre_spikes[-1:]                                # (1, n_in)

    # --- spike buffer roll (tiny O(D*n_in); newest row at index D-1) --------
    # TODO(synk): a circular buffer (head index carried in state) would avoid
    # this whole-buffer copy per step, at the cost of changing the state layout.
    new_buf = jnp.concatenate([state["spike_buffer"][1:], pre_last], axis=0)

    # --- matmul LHS ----------------------------------------------------------
    if B == 1:
        # Delayed gather via the precomputed per-column row index: no weight-
        # sized delay read, no cross-sublane reduction inside the kernel.
        delayed = jnp.take_along_axis(new_buf, state["delay_idx"], axis=0)
        x_lhs = jnp.clip(delayed, 0.0, 1.0)                   # (1, n_in)
    else:
        x_lhs = pre_spikes                                    # (B, n_in)
    Bq = x_lhs.shape[0]

    do_learning = bool(learning) and (post_spikes is not None)
    if do_learning:
        post_spikes = post_spikes.astype(jnp.float32)
        if post_spikes.ndim == 1:
            post_spikes = post_spikes[None, :]
        post_last = post_spikes[-1:]                          # (1, n_out)
        # Updated traces (the weight update uses the NEW traces, per reference).
        x_new = hp["alpha_plus"] * state["x_trace"] + pre_last    # (1, n_in)
        y_new = hp["alpha_minus"] * state["y_trace"] + post_last  # (1, n_out)
        lr = float(hp["learning_rate"])
        a = (lr * float(hp["A_plus"])) * x_new.reshape(n_in, 1)   # column
        c = (lr * float(hp["A_minus"])) * pre_last.reshape(n_in, 1)
        b = post_last                                             # row
        d = y_new                                                 # row

    # --- tiling: <= 512 KiB f32 weight tiles (generation-safe incl. v7x) -----
    TK = n_in if n_in <= 1024 else 512        # contraction tile (sublanes of W_t)
    TN = n_out if n_out <= 512 else 256       # output tile (lanes of W_t)
    n_in_p, n_out_p = _round_up(n_in, TK), _round_up(n_out, TN)
    grid = (n_out_p // TN, n_in_p // TK)      # (j: N_out tiles, k: N_in tiles)

    x_spec = pl.BlockSpec((Bq, TK), lambda j, k: (0, k))
    w_spec = pl.BlockSpec((TK, TN), lambda j, k: (k, j))
    col_spec = pl.BlockSpec((TK, 1), lambda j, k: (k, 0))
    row_spec = pl.BlockSpec((1, TN), lambda j, k: (0, j))
    cur_spec = pl.BlockSpec((Bq, TN), lambda j, k: (0, j))
    cparams = pltpu.CompilerParams(
        dimension_semantics=("parallel", "arbitrary"),   # megacore over N_out
        vmem_limit_bytes=64 * 1024 * 1024)

    x_p = _pad2(x_lhs, Bq, n_in_p)
    w_p = _pad2(wt, n_in_p, n_out_p)

    if do_learning:
        kern = functools.partial(_fwd_update_kernel,
                                 w_min=float(hp["w_min"]),
                                 w_max=float(hp["w_max"]))
        cur_p, wt_new = pl.pallas_call(
            kern,
            out_shape=(jax.ShapeDtypeStruct((Bq, n_out_p), jnp.float32),
                       jax.ShapeDtypeStruct((n_in_p, n_out_p), jnp.float32)),
            grid=grid,
            in_specs=[x_spec, w_spec, col_spec, row_spec, col_spec, row_spec],
            out_specs=(cur_spec, w_spec),
            input_output_aliases={1: 1},      # update the weight in place
            compiler_params=cparams,
        )(x_p, w_p,
          _pad2(a, n_in_p, 1), _pad2(b, 1, n_out_p),
          _pad2(c, n_in_p, 1), _pad2(d, 1, n_out_p))
        if (n_in_p, n_out_p) != (n_in, n_out):
            wt_new = wt_new[:n_in, :n_out]
        xtr_new, ytr_new = x_new, y_new
    else:
        # No learning: kernel emits only the current; no weight output at all.
        cur_p = pl.pallas_call(
            _fwd_kernel,
            out_shape=jax.ShapeDtypeStruct((Bq, n_out_p), jnp.float32),
            grid=grid,
            in_specs=[x_spec, w_spec],
            out_specs=cur_spec,
            compiler_params=cparams,
        )(x_p, w_p)
        wt_new = wt
        xtr_new, ytr_new = state["x_trace"], state["y_trace"]

    current = cur_p[:, :n_out] if n_out_p != n_out else cur_p
    new_state = dict(state, weight_t=wt_new, spike_buffer=new_buf,
                     x_trace=xtr_new, y_trace=ytr_new)
    return current, new_state


def init_stdp(key, input_size, output_size, delay_max):
    k1, k2 = jax.random.split(key)
    weight = jax.random.uniform(k1, (output_size, input_size), jnp.float32) * 0.5
    delay = jax.random.randint(
        k2, (output_size, input_size), 1, delay_max + 1).astype(jnp.float32)
    return dict(
        weight_t=jnp.asarray(weight.T),                  # stored (N_in, N_out)
        delay=delay,
        delay_idx=compute_delay_idx(delay, delay_max),   # (1, N_in) int32
        spike_buffer=jnp.zeros((delay_max, input_size), jnp.float32),
        x_trace=jnp.zeros((1, input_size), jnp.float32),
        y_trace=jnp.zeros((1, output_size), jnp.float32),
    )


# ---------------------------------------------------------------------------
# Pure-JAX mirror of the PyTorch forward (for correctness checking only)
# ---------------------------------------------------------------------------
def _ref_forward(state, pre_spikes, post_spikes, learning, hp):
    if pre_spikes.ndim == 1:
        pre_spikes = pre_spikes[None, :]
    pre_spikes = pre_spikes.astype(jnp.float32)
    B, n_in = pre_spikes.shape
    w = state["weight_t"].T                                  # (n_out, n_in)
    buf = jnp.concatenate([state["spike_buffer"][1:], pre_spikes[-1:]], axis=0)
    idx = jnp.clip(
        jnp.round(jnp.mean(state["delay"], axis=0)).astype(jnp.int32) - 1,
        0, int(hp["delay_max"]) - 1)                         # (n_in,)
    delayed = jnp.clip(buf[idx, jnp.arange(n_in)], 0.0, 1.0)
    cur = (delayed[None, :] if B == 1 else pre_spikes) @ w.T
    x_tr, y_tr, w_new = state["x_trace"], state["y_trace"], w
    if learning and post_spikes is not None:
        post_spikes = post_spikes.astype(jnp.float32)
        if post_spikes.ndim == 1:
            post_spikes = post_spikes[None, :]
        pre_l, post_l = pre_spikes[-1], post_spikes[-1]
        x_tr = hp["alpha_plus"] * state["x_trace"] + pre_l
        y_tr = hp["alpha_minus"] * state["y_trace"] + post_l
        ltp = jnp.outer(post_l, x_tr[0]) * hp["A_plus"]
        ltd = jnp.outer(y_tr[0], pre_l) * hp["A_minus"]
        w_new = jnp.clip(w + (ltp - ltd) * hp["learning_rate"],
                         hp["w_min"], hp["w_max"])
    return cur, w_new, buf, x_tr, y_tr


if __name__ == "__main__":
    input_size, output_size, delay_max = 128, 128, 10
    hp = dict(
        tau_plus=20.0, tau_minus=20.0, A_plus=0.01, A_minus=0.01,
        w_max=1.0, w_min=0.0, delay_max=delay_max, learning_rate=1.0,
        alpha_plus=math.exp(-1.0 / 20.0),
        alpha_minus=math.exp(-1.0 / 20.0),
    )

    key = jax.random.PRNGKey(0)
    kinit, k1, k2, k3, k4 = jax.random.split(key, 5)
    state = init_stdp(kinit, input_size, output_size, delay_max)

    def fwd_fn(state, pre, post, learning):
        return stdp_forward(state, pre, post, learning, hp=hp)

    fwd = jax.jit(fwd_fn, static_argnames=("learning",))

    # --- single-sample step (B==1: delayed-gather path), with learning ------
    pre1 = (jax.random.uniform(k1, (input_size,)) < 0.3).astype(jnp.float32)
    post1 = (jax.random.uniform(k2, (output_size,)) < 0.3).astype(jnp.float32)
    cur1_ref, w1_ref, buf1_ref, x1_ref, y1_ref = _ref_forward(
        state, pre1, post1, True, hp)
    cur1, state1 = fwd(state, pre1, post1, learning=True)

    # --- batched step (B==2: raw pre_spikes path), with learning -------------
    pre2 = (jax.random.uniform(k3, (2, input_size)) < 0.3).astype(jnp.float32)
    post2 = (jax.random.uniform(k4, (2, output_size)) < 0.3).astype(jnp.float32)
    cur2_ref, w2_ref, _, _, _ = _ref_forward(state1, pre2, post2, True, hp)
    cur2, state2 = fwd(state1, pre2, post2, learning=True)

    # --- inference step (learning disabled: no weight output emitted) --------
    cur3, state3 = fwd(state2, pre1, None, learning=False)

    jax.block_until_ready((cur1, cur2, cur3, state3))

    assert cur1.shape == (1, output_size) and cur2.shape == (2, output_size)
    # state updates (pure VPU / glue) match the reference tightly
    assert jnp.allclose(state1["weight_t"].T, w1_ref, rtol=1e-5, atol=1e-5)
    assert jnp.allclose(state2["weight_t"].T, w2_ref, rtol=1e-5, atol=1e-5)
    assert jnp.allclose(state1["spike_buffer"], buf1_ref)
    assert jnp.allclose(state1["x_trace"], x1_ref)
    assert jnp.allclose(state1["y_trace"], y1_ref)
    # currents match up to MXU accumulation precision
    assert jnp.allclose(cur1, cur1_ref, rtol=5e-2, atol=5e-2)
    assert jnp.allclose(cur2, cur2_ref, rtol=5e-2, atol=5e-2)
    # no-learning path leaves the weights untouched
    assert jnp.allclose(state3["weight_t"], state2["weight_t"])
    print("KERNEL_OK")
</pallas_src>

<mosaic_0001>
module attributes {stable_mosaic.version = 11 : i64} {
  func.func @_fwd_update_kernel(%arg0: i32, %arg1: i32, %arg2: memref<1x128xf32, #tpu.memory_space<vmem>>, %arg3: memref<128x128xf32, #tpu.memory_space<vmem>>, %arg4: memref<128x1xf32, #tpu.memory_space<vmem>>, %arg5: memref<1x128xf32, #tpu.memory_space<vmem>>, %arg6: memref<128x1xf32, #tpu.memory_space<vmem>>, %arg7: memref<1x128xf32, #tpu.memory_space<vmem>>, %arg8: memref<1x128xf32, #tpu.memory_space<vmem>>, %arg9: memref<128x128xf32, #tpu.memory_space<vmem>>) attributes {dimension_semantics = [#tpu.dimension_semantics<parallel>, #tpu.dimension_semantics<arbitrary>], iteration_bounds = array<i64: 1, 1>, scalar_prefetch = 0 : i64, scratch_operands = 0 : i64, tpu.core_type = #tpu.core_type<tc>, window_params = [{transform_indices = @transform_0, window_bounds = array<i64: 1, 128>}, {transform_indices = @transform_1, window_bounds = array<i64: 128, 128>}, {transform_indices = @transform_2, window_bounds = array<i64: 128, 1>}, {transform_indices = @transform_3, window_bounds = array<i64: 1, 128>}, {transform_indices = @transform_4, window_bounds = array<i64: 128, 1>}, {transform_indices = @transform_5, window_bounds = array<i64: 1, 128>}, {transform_indices = @transform_6, window_bounds = array<i64: 1, 128>}, {transform_indices = @transform_7, window_bounds = array<i64: 128, 128>}]} {
    %c0_i32 = arith.constant 0 : i32
    %0 = arith.cmpi eq, %arg1, %c0_i32 : i32
    %1 = arith.extui %0 : i1 to i32
    %c0_i32_0 = arith.constant 0 : i32
    %2 = arith.cmpi ne, %1, %c0_i32_0 : i32
    scf.if %2 {
      %cst_22 = arith.constant 0.000000e+00 : f32
      %27 = vector.broadcast %cst_22 : f32 to vector<1x128xf32>
      %c0_23 = arith.constant 0 : index
      %c0_24 = arith.constant 0 : index
      %28 = vector.load %arg8[%c0_23, %c0_24] : memref<1x128xf32, #tpu.memory_space<vmem>>, vector<1x128xf32>
      tpu.vector_store %arg8[%c0_23, %c0_24], %27 {strides = array<i32>} : memref<1x128xf32, #tpu.memory_space<vmem>>, vector<1x128xf32>,
    } else {
    }
    %c0 = arith.constant 0 : index
    %c0_1 = arith.constant 0 : index
    %3 = vector.load %arg8[%c0, %c0_1] : memref<1x128xf32, #tpu.memory_space<vmem>>, vector<1x128xf32>
    %c0_2 = arith.constant 0 : index
    %c0_3 = arith.constant 0 : index
    %4 = vector.load %arg2[%c0_2, %c0_3] : memref<1x128xf32, #tpu.memory_space<vmem>>, vector<1x128xf32>
    %c0_4 = arith.constant 0 : index
    %c0_5 = arith.constant 0 : index
    %5 = vector.load %arg3[%c0_4, %c0_5] : memref<128x128xf32, #tpu.memory_space<vmem>>, vector<128x128xf32>
    %cst = arith.constant dense<0.000000e+00> : vector<1x128xf32>
    %6 = tpu.matmul %4, %5, %cst {dimension_numbers = #tpu.dot_dimension_numbers<[1], [0], [0], [1], [0, 0, 1, 1], [], []>} : vector<1x128xf32>, vector<128x128xf32>, vector<1x128xf32> -> vector<1x128xf32>
    %7 = arith.addf %3, %6 : vector<1x128xf32>
    %c0_6 = arith.constant 0 : index
    %c0_7 = arith.constant 0 : index
    %8 = vector.load %arg8[%c0_6, %c0_7] : memref<1x128xf32, #tpu.memory_space<vmem>>, vector<1x128xf32>
    tpu.vector_store %arg8[%c0_6, %c0_7], %7 {strides = array<i32>} : memref<1x128xf32, #tpu.memory_space<vmem>>, vector<1x128xf32>,
    %c0_8 = arith.constant 0 : index
    %c0_9 = arith.constant 0 : index
    %9 = vector.load %arg3[%c0_8, %c0_9] : memref<128x128xf32, #tpu.memory_space<vmem>>, vector<128x128xf32>
    %c0_10 = arith.constant 0 : index
    %c0_11 = arith.constant 0 : index
    %10 = vector.load %arg4[%c0_10, %c0_11] : memref<128x1xf32, #tpu.memory_space<vmem>>, vector<128x1xf32>
    %c0_12 = arith.constant 0 : index
    %c0_13 = arith.constant 0 : index
    %11 = vector.load %arg5[%c0_12, %c0_13] : memref<1x128xf32, #tpu.memory_space<vmem>>, vector<1x128xf32>
    %12 = vector.broadcast %10 : vector<128x1xf32> to vector<128x128xf32>
    %13 = vector.broadcast %11 : vector<1x128xf32> to vector<128x128xf32>
    %14 = arith.mulf %12, %13 : vector<128x128xf32>
    %15 = arith.addf %9, %14 : vector<128x128xf32>
    %c0_14 = arith.constant 0 : index
    %c0_15 = arith.constant 0 : index
    %16 = vector.load %arg6[%c0_14, %c0_15] : memref<128x1xf32, #tpu.memory_space<vmem>>, vector<128x1xf32>
    %c0_16 = arith.constant 0 : index
    %c0_17 = arith.constant 0 : index
    %17 = vector.load %arg7[%c0_16, %c0_17] : memref<1x128xf32, #tpu.memory_space<vmem>>, vector<1x128xf32>
    %18 = vector.broadcast %16 : vector<128x1xf32> to vector<128x128xf32>
    %19 = vector.broadcast %17 : vector<1x128xf32> to vector<128x128xf32>
    %20 = arith.mulf %18, %19 : vector<128x128xf32>
    %21 = arith.subf %15, %20 : vector<128x128xf32>
    %cst_18 = arith.constant 0.000000e+00 : f32
    %cst_19 = arith.constant 1.000000e+00 : f32
    %22 = vector.broadcast %cst_18 : f32 to vector<128x128xf32>
    %23 = arith.maximumf %22, %21 : vector<128x128xf32>
    %24 = vector.broadcast %cst_19 : f32 to vector<128x128xf32>
    %25 = arith.minimumf %24, %23 : vector<128x128xf32>
    %c0_20 = arith.constant 0 : index
    %c0_21 = arith.constant 0 : index
    %26 = vector.load %arg9[%c0_20, %c0_21] : memref<128x128xf32, #tpu.memory_space<vmem>>, vector<128x128xf32>
    tpu.vector_store %arg9[%c0_20, %c0_21], %25 {strides = array<i32>} : memref<128x128xf32, #tpu.memory_space<vmem>>, vector<128x128xf32>,
    return
  }
  func.func @transform_0(%arg0: i32, %arg1: i32) -> (i32, i32) {
    %c0_i32 = arith.constant 0 : i32
    %c0_i32_0 = arith.constant 0 : i32
    return %c0_i32, %arg1 : i32, i32
  }
  func.func @transform_1(%arg0: i32, %arg1: i32) -> (i32, i32) {
    %c0_i32 = arith.constant 0 : i32
    return %arg1, %arg0 : i32, i32
  }
  func.func @transform_2(%arg0: i32, %arg1: i32) -> (i32, i32) {
    %c0_i32 = arith.constant 0 : i32
    %c0_i32_0 = arith.constant 0 : i32
    return %arg1, %c0_i32 : i32, i32
  }
  func.func @transform_3(%arg0: i32, %arg1: i32) -> (i32, i32) {
    %c0_i32 = arith.constant 0 : i32
    %c0_i32_0 = arith.constant 0 : i32
    return %c0_i32, %arg0 : i32, i32
  }
  func.func @transform_4(%arg0: i32, %arg1: i32) -> (i32, i32) {
    %c0_i32 = arith.constant 0 : i32
    %c0_i32_0 = arith.constant 0 : i32
    return %arg1, %c0_i32 : i32, i32
  }
  func.func @transform_5(%arg0: i32, %arg1: i32) -> (i32, i32) {
    %c0_i32 = arith.constant 0 : i32
    %c0_i32_0 = arith.constant 0 : i32
    return %c0_i32, %arg0 : i32, i32
  }
  func.func @transform_6(%arg0: i32, %arg1: i32) -> (i32, i32) {
    %c0_i32 = arith.constant 0 : i32
    %c0_i32_0 = arith.constant 0 : i32
    return %c0_i32, %arg0 : i32, i32
  }
  func.func @transform_7(%arg0: i32, %arg1: i32) -> (i32, i32) {
    %c0_i32 = arith.constant 0 : i32
    return %arg1, %arg0 : i32, i32
  }
}

</mosaic_0001>

<bundles_post_ra>
// kernel: fwd_fn.1
= control target key start
LH: loop header
LB: loop body
LE: loop exit
PB: predicated region body
PF: predicated region fallthrough
CT: control target
= control target key end

     0   :  { %13 = vsyncpa [#allocation3], 0  ;;  %s1136_s0 = inlined_call_operand.hbm [shape: f32[1,128], index: 0, kind: input, shape index: {}]   ;;  %s1137_s1 = inlined_call_operand.hbm [shape: f32[128,128], index: 1, kind: input, shape index: {}, may-alias: {1,7}]   ;;  %s1138_s2 = inlined_call_operand.hbm [shape: f32[128,1], index: 2, kind: input, shape index: {}]   ;;  %s1139_s3 = inlined_call_operand.hbm [shape: f32[1,128], index: 3, kind: input, shape index: {}]   ;;  %s1140_s4 = inlined_call_operand.hbm [shape: f32[128,1], index: 4, kind: input, shape index: {}]   ;;  %s1141_s5 = inlined_call_operand.hbm [shape: f32[1,128], index: 5, kind: input, shape index: {}]   ;;  %s1142_s6 = inlined_call_operand.hbm [shape: f32[1,128], index: 6, kind: output, shape index: {0}]   ;;  %s1143_s7 = inlined_call_operand.hbm [shape: f32[128,128], index: 7, kind: output, shape index: {1}, may-alias: {1,7}]  }
   0x1   :  { %14 = vsyncpa [#allocation6], 0 }
   0x2   :  { %15 = vsyncpa [#allocation9], 0 }
   0x3   :  { %16 = vsyncpa [#allocation12], 0 }
   0x4   :  { %17 = vsyncpa [#allocation4], 0 }
   0x5   :  { %18 = vsyncpa [#allocation15], 0  ;;  %s848_s24 = smov [#allocation5]   ;;  %s660_s28 = scalar_lea.hbm %s1137_s1, 2048 }
   0x6   :  { %s34_s25 = sshll.u32 %s848_s24, 4  ;;  %p661_p0 = scmp.ne.s32.totalorder %s1137_s1, %s660_s28  ;;  %s35_s25 = int_to_ptr.vmem [resolvable:$true] %s34_s25 }
   0x7   :  { %p664_p1 = scmp.lt.u32.totalorder %s660_s28, %s1137_s1 }
   0x9   :  { %p666_p2 = pnand %p664_p1, %p661_p0 }
   0xb   :  { %669 = shalt.err (!%p666_p2)
}
   0xc   :  { %s670_s10 = scalar_lea.vmem %s35_s25, 2048  ;;  %p675_p4 = scmp.lt.s32.totalorder %s35_s25, %s35_s25 }
   0xd   :  { %p671_p3 = scmp.ne.s32.totalorder %s35_s25, %s670_s10  ;;  %p676_p5 = scmp.lt.s32.totalorder %s670_s10, %s670_s10 }
   0xf   :  { %p677_p6 = por %p676_p5, %p675_p4 }
  0x11   :  { %p678_p7 = pnand %p677_p6, %p671_p3 }
  0x13   :  { %681 = shalt.err (!%p678_p7)
}
  0x14   :  { %s849_s11 = smov 128   ;;  %s850_s12 = smov 8  }
  0x15   :  { %40 = dma.hbm_to_vmem [thread:$0]  %s1137_s1, 2048, %s35_s25, [#allocation6], %s849_s11, %s849_s11, %s850_s12  }
  0x16   :  { %s851_s15 = smov [#allocation8]   ;;  %s852_s17 = smov [#allocation2]  }
  0x17   :  { %s59_s16 = sshll.u32 %s851_s15, 4  ;;  %s25_s18 = sshll.u32 %s852_s17, 4  ;;  %s60_s16 = int_to_ptr.vmem [resolvable:$true] %s59_s16  ;;  %s26_s18 = int_to_ptr.vmem [resolvable:$true] %s25_s18 }
  0x18   :  { %s682_s21 = scalar_lea.hbm %s1139_s3, 16 }
  0x19   :  { %p683_p8 = scmp.ne.s32.totalorder %s1139_s3, %s682_s21  ;;  %p686_p9 = scmp.lt.u32.totalorder %s682_s21, %s1139_s3 }
  0x1b   :  { %p688_p10 = pnand %p686_p9, %p683_p8 }
  0x1d   :  { %691 = shalt.err (!%p688_p10)
}
  0x1e   :  { %s692_s1 = scalar_lea.vmem %s60_s16, 16  ;;  %s696_s25 = scalar_lea.vmem %s60_s16, 32 }
  0x1f   :  { %p693_p11 = scmp.ne.s32.totalorder %s60_s16, %s692_s1  ;;  %p697_p12 = scmp.lt.s32.totalorder %s60_s16, %s60_s16 }
  0x20   :  { %p698_p13 = scmp.lt.s32.totalorder %s696_s25, %s692_s1 }
  0x22   :  { %p699_p0 = por %p698_p13, %p697_p12 }
  0x24   :  { %p700_p1 = pnand %p699_p0, %p693_p11 }
  0x26   :  { %703 = shalt.err (!%p700_p1)
}
  0x27   :  { %62 = dma.hbm_to_vmem [thread:$0]  %s1139_s3, 16, %s60_s16, [#allocation9]  }
  0x28   :  { %s704_s8 = scalar_lea.hbm %s1136_s0, 16 }
  0x29   :  { %p705_p2 = scmp.ne.s32.totalorder %s1136_s0, %s704_s8  ;;  %p708_p3 = scmp.lt.u32.totalorder %s704_s8, %s1136_s0 }
  0x2b   :  { %p710_p4 = pnand %p708_p3, %p705_p2 }
  0x2d   :  { %713 = shalt.err (!%p710_p4)
}
  0x2e   :  { %s714_s15 = scalar_lea.vmem %s26_s18, 16  ;;  %s718_s17 = scalar_lea.vmem %s26_s18, 32 }
  0x2f   :  { %p715_p5 = scmp.ne.s32.totalorder %s26_s18, %s714_s15  ;;  %p719_p6 = scmp.lt.s32.totalorder %s26_s18, %s26_s18 }
  0x30   :  { %p720_p7 = scmp.lt.s32.totalorder %s718_s17, %s714_s15 }
  0x32   :  { %p721_p8 = por %p720_p7, %p719_p6 }
  0x34   :  { %p722_p9 = pnand %p721_p8, %p715_p5 }
  0x36   :  { %725 = shalt.err (!%p722_p9)
}
  0x37   :  { %28 = dma.hbm_to_vmem [thread:$0]  %s1136_s0, 16, %s26_s18, [#allocation3]  }
  0x38   :  { %s853_s19 = smov [#allocation7]   ;;  %s854_s21 = smov [#allocation10]  }
  0x39   :  { %s46_s20 = sshll.u32 %s853_s19, 4  ;;  %s68_s22 = sshll.u32 %s854_s21, 4  ;;  %s47_s20 = int_to_ptr.vmem [resolvable:$true] %s46_s20  ;;  %s69_s22 = int_to_ptr.vmem [resolvable:$true] %s68_s22 }
  0x3a   :  { %s726_s26 = scalar_lea.hbm %s1138_s2, 2048 }
  0x3b   :  { %p727_p10 = scmp.ne.s32.totalorder %s1138_s2, %s726_s26  ;;  %p730_p11 = scmp.lt.u32.totalorder %s726_s26, %s1138_s2 }
  0x3d   :  { %p732_p12 = pnand %p730_p11, %p727_p10 }
  0x3f   :  { %735 = shalt.err (!%p732_p12)
}
  0x40   :  { %s736_s0 = scalar_lea.vmem %s47_s20, 2048  ;;  %p741_p0 = scmp.lt.s32.totalorder %s47_s20, %s47_s20 }
  0x41   :  { %p737_p13 = scmp.ne.s32.totalorder %s47_s20, %s736_s0  ;;  %p742_p1 = scmp.lt.s32.totalorder %s736_s0, %s736_s0 }
  0x43   :  { %p743_p2 = por %p742_p1, %p741_p0 }
  0x45   :  { %p744_p3 = pnand %p743_p2, %p737_p13 }
  0x47   :  { %747 = shalt.err (!%p744_p3)
}
  0x48   :  { %52 = dma.hbm_to_vmem [thread:$0]  %s1138_s2, 2048, %s47_s20, [#allocation6], %s849_s11, %s849_s11, %s850_s12  }
  0x49   :  { %s748_s9 = scalar_lea.hbm %s1140_s4, 2048 }
  0x4a   :  { %p749_p4 = scmp.ne.s32.totalorder %s1140_s4, %s748_s9  ;;  %p752_p5 = scmp.lt.u32.totalorder %s748_s9, %s1140_s4 }
  0x4c   :  { %p754_p6 = pnand %p752_p5, %p749_p4 }
  0x4e   :  { %757 = shalt.err (!%p754_p6)
}
  0x4f   :  { %s758_s17 = scalar_lea.vmem %s69_s22, 2048  ;;  %p763_p8 = scmp.lt.s32.totalorder %s69_s22, %s69_s22 }
  0x50   :  { %p759_p7 = scmp.ne.s32.totalorder %s69_s22, %s758_s17  ;;  %p764_p9 = scmp.lt.s32.totalorder %s758_s17, %s758_s17 }
  0x52   :  { %p765_p10 = por %p764_p9, %p763_p8 }
  0x54   :  { %p766_p11 = pnand %p765_p10, %p759_p7 }
  0x56   :  { %769 = shalt.err (!%p766_p11)
}
  0x57   :  { %74 = dma.hbm_to_vmem [thread:$0]  %s1140_s4, 2048, %s69_s22, [#allocation9], %s849_s11, %s849_s11, %s850_s12  }
  0x58   :  { %s855_s16 = smov [#allocation11]   ;;  %s770_s23 = scalar_lea.hbm %s1141_s5, 16 }
  0x59   :  { %s81_s19 = sshll.u32 %s855_s16, 4  ;;  %p771_p12 = scmp.ne.s32.totalorder %s1141_s5, %s770_s23  ;;  %s82_s19 = int_to_ptr.vmem [resolvable:$true] %s81_s19 }
  0x5a   :  { %p774_p13 = scmp.lt.u32.totalorder %s770_s23, %s1141_s5 }
  0x5c   :  { %p776_p0 = pnand %p774_p13, %p771_p12 }
  0x5e   :  { %779 = shalt.err (!%p776_p0)
}
  0x5f   :  { %s780_s27 = scalar_lea.vmem %s82_s19, 16  ;;  %s784_s4 = scalar_lea.vmem %s82_s19, 32 }
  0x60   :  { %p781_p1 = scmp.ne.s32.totalorder %s82_s19, %s780_s27  ;;  %p785_p2 = scmp.lt.s32.totalorder %s82_s19, %s82_s19 }
  0x61   :  { %p786_p3 = scmp.lt.s32.totalorder %s784_s4, %s780_s27 }
  0x63   :  { %p787_p4 = por %p786_p3, %p785_p2 }
  0x65   :  { %p788_p5 = pnand %p787_p4, %p781_p1 }
  0x67   :  { %791 = shalt.err (!%p788_p5)
}
  0x68   :  { %84 = dma.hbm_to_vmem [thread:$0]  %s1141_s5, 16, %s82_s19, [#allocation12]  }
  0x69   :  { %836 = dma.done.wait [#allocation3], 16  }
  0x6a   :  { %837 = vsyncadd [#allocation3], 4294967280 }
  0x6b   :  { %838 = dma.done.wait [#allocation6], 4096  }
  0x6c   :  { %839 = vsyncadd [#allocation6], 4294963200 }
  0x6d   :  { %840 = dma.done.wait [#allocation9], 2064  }
  0x6e   :  { %841 = vsyncadd [#allocation9], 4294965232 }
  0x6f   :  { %842 = dma.done.wait [#allocation12], 16  }
  0x70   :  { %843 = vsyncadd [#allocation12], 4294967280  ;;  %v856_v0 = vmov 0   ;;  %v857_v1 = vmov 0.0   ;;  %v858_v2 = vmov 0.0|0.0   ;;  %vm859_vm0 = vmmov 0  }
  0x71   :  { %659 = vset.pattern.permute.xlu1 %v856_v0  ;;  %658 = vset.pattern.permute.xlu0 %v856_v0  ;;  %107 = vst [vmem:[#allocation13] sm:$0x1] %v857_v1  ;;  %v216_v3 = vld [vmem:[#allocation7 + $0x10] sm:$0xff]  ;;  %v214_v4 = vld [vmem:[#allocation7] sm:$0xff]  ;;  %v986_v6 = vld [vmem:[#allocation5 + $0x8] sm:$0xff]  ;;  %s860_s5 = smov [#allocation14]  }
  0x72   :  { %620 = vmatprep.subr.bf16.mxu0 %v858_v2  ;;  %617 = vmatprep.mubr.msk.f32.mxu0 %vm859_vm0, %v857_v1  ;;  %v984_v5 = vld [vmem:[#allocation5] sm:$0xff]  ;;  %v217_v7 = vld [vmem:[#allocation7 + $0x18] sm:$0xff]  ;;  %v215_v9 = vld [vmem:[#allocation7 + $0x8] sm:$0xff]  ;;  %s547_s0 = sshll.u32 %s860_s5, 4  ;;  %s548_s0 = int_to_ptr.vmem [resolvable:$true] %s547_s0 }
  0x73   :  { %243 = vperm.xlu1 %659, %v216_v3   ;;  %233 = vperm.xlu0 %658, %v214_v4   ;;  %v621_v8 = vpack.c.bf16 %v986_v6, %v984_v5  ;;  %v990_v10 = vld [vmem:[#allocation5 + $0x10] sm:$0xff]  ;;  %v992_v11 = vld [vmem:[#allocation5 + $0x18] sm:$0xff]  ;;  %v996_v13 = vld [vmem:[#allocation5 + $0x20] sm:$0xff]  ;;  %s792_s18 = scalar_lea.vmem %s548_s0, 2048  ;;  %p797_p7 = scmp.lt.s32.totalorder %s548_s0, %s548_s0 }
  0x74   :  { %v624_v12 = vpack.c.bf16 %v992_v11, %v990_v10  ;;  %v998_v14 = vld [vmem:[#allocation5 + $0x28] sm:$0xff]  ;;  %v218_v16 = vld [vmem:[#allocation7 + $0x20] sm:$0xff]  ;;  %v1003_v18 = vld [vmem:[#allocation5 + $0x30] sm:$0xff]  ;;  %p793_p6 = scmp.ne.s32.totalorder %s548_s0, %s792_s18  ;;  %p798_p8 = scmp.lt.s32.totalorder %s792_s18, %s792_s18 }
  0x75   :  { %622 = vmatpush3.bf16.msra.mxu0 %v621_v8  ;;  %v219_v15 = vld [vmem:[#allocation7 + $0x28] sm:$0xff]  ;;  %v627_v17 = vpack.c.bf16 %v998_v14, %v996_v13  ;;  %v1005_v19 = vld [vmem:[#allocation5 + $0x38] sm:$0xff]  ;;  %v220_v21 = vld [vmem:[#allocation7 + $0x30] sm:$0xff] }
  0x76   :  { %623 = vmatprep.subr.bf16.mxu0 %v858_v2  ;;  %v221_v20 = vld [vmem:[#allocation7 + $0x38] sm:$0xff]  ;;  %v630_v22 = vpack.c.bf16 %v1005_v19, %v1003_v18  ;;  %v1010_v23 = vld [vmem:[#allocation5 + $0x40] sm:$0xff]  ;;  %v1012_v24 = vld [vmem:[#allocation5 + $0x48] sm:$0xff]  ;;  %p799_p9 = por %p798_p8, %p797_p7 }
  0x77   :  { %248 = vperm.xlu1 %659, %v217_v7   ;;  %238 = vperm.xlu0 %658, %v215_v9   ;;  %v223_v25 = vld [vmem:[#allocation7 + $0x48] sm:$0xff]  ;;  %v222_v26 = vld [vmem:[#allocation7 + $0x40] sm:$0xff]  ;;  %v633_v27 = vpack.c.bf16 %v1012_v24, %v1010_v23  ;;  %v1017_v28 = vld [vmem:[#allocation5 + $0x50] sm:$0xff] }
  0x78   :  { %v1019_v29 = vld [vmem:[#allocation5 + $0x58] sm:$0xff]  ;;  %v224_v31 = vld [vmem:[#allocation7 + $0x50] sm:$0xff]  ;;  %v1024_v33 = vld [vmem:[#allocation5 + $0x60] sm:$0xff]  ;;  %p800_p10 = pnand %p799_p9, %p793_p6 }
  0x79   :  { %625 = vmatpush3.bf16.msra.mxu0 %v624_v12  ;;  %v225_v30 = vld [vmem:[#allocation7 + $0x58] sm:$0xff]  ;;  %v636_v32 = vpack.c.bf16 %v1019_v29, %v1017_v28  ;;  %v1026_v34 = vld [vmem:[#allocation5 + $0x68] sm:$0xff]  ;;  %v226_v36 = vld [vmem:[#allocation7 + $0x60] sm:$0xff] }
  0x7a   :  { %626 = vmatprep.subr.bf16.mxu0 %v858_v2  ;;  %v227_v35 = vld [vmem:[#allocation7 + $0x68] sm:$0xff]  ;;  %v639_v37 = vpack.c.bf16 %v1026_v34, %v1024_v33  ;;  %v1031_v38 = vld [vmem:[#allocation5 + $0x70] sm:$0xff]  ;;  %v1033_v39 = vld [vmem:[#allocation5 + $0x78] sm:$0xff] }
  0x7b   :  { %258 = vperm.xlu1 %659, %v219_v15   ;;  %253 = vperm.xlu0 %658, %v218_v16   ;;  %v229_v40 = vld [vmem:[#allocation7 + $0x78] sm:$0xff]  ;;  %v228_v41 = vld [vmem:[#allocation7 + $0x70] sm:$0xff]  ;;  %v642_v42 = vpack.c.bf16 %v1033_v39, %v1031_v38  ;;  %v349_v44 = vld [vmem:[#allocation10] sm:$0xff] }
  0x7c   :  { %v350_v43 = vld [vmem:[#allocation10 + $0x8] sm:$0xff]  ;;  %v109_v45 = vld [vmem:[#allocation2] sm:$0x1]  ;;  %v351_v47 = vld [vmem:[#allocation10 + $0x10] sm:$0xff] }
  0x7d   :  { %628 = vmatpush3.bf16.msra.mxu0 %v627_v17  ;;  %v352_v46 = vld [vmem:[#allocation10 + $0x18] sm:$0xff]  ;;  %v354_v48 = vld [vmem:[#allocation10 + $0x28] sm:$0xff]  ;;  %v353_v49 = vld [vmem:[#allocation10 + $0x20] sm:$0xff] }
  0x7e   :  { %629 = vmatprep.subr.bf16.mxu0 %v858_v2  ;;  %v356_v50 = vld [vmem:[#allocation10 + $0x38] sm:$0xff]  ;;  %v355_v51 = vld [vmem:[#allocation10 + $0x30] sm:$0xff]  ;;  %v358_v52 = vld [vmem:[#allocation10 + $0x48] sm:$0xff] }
  0x7f   :  { %268 = vperm.xlu1 %659, %v221_v20   ;;  %263 = vperm.xlu0 %658, %v220_v21   ;;  %v357_v53 = vld [vmem:[#allocation10 + $0x40] sm:$0xff]  ;;  %v360_v54 = vld [vmem:[#allocation10 + $0x58] sm:$0xff]  ;;  %v359_v55 = vld [vmem:[#allocation10 + $0x50] sm:$0xff] }
  0x80   :  { %v362_v56 = vld [vmem:[#allocation10 + $0x68] sm:$0xff]  ;;  %v361_v57 = vld [vmem:[#allocation10 + $0x60] sm:$0xff]  ;;  %v364_v58 = vld [vmem:[#allocation10 + $0x78] sm:$0xff] }
  0x81   :  { %631 = vmatpush3.bf16.msra.mxu0 %v630_v22  ;;  %v363_v59 = vld [vmem:[#allocation10 + $0x70] sm:$0xff]  ;;  %v1043_v12 = vld [vmem:[#allocation8] ss:$0 sm:$0xff] }
  0x82   :  { %632 = vmatprep.subr.bf16.mxu0 %v858_v2 }
  0x83   :  { %278 = vperm.xlu1 %659, %v223_v25   ;;  %273 = vperm.xlu0 %658, %v222_v26   ;;  %v1055_v25 = vld [vmem:[#allocation11] ss:$0 sm:$0xff] }
  0x85   :  { %634 = vmatpush3.bf16.msra.mxu0 %v633_v27 }
  0x86   :  { %635 = vmatprep.subr.bf16.mxu0 %v858_v2 }
  0x87   :  { %288 = vperm.xlu1 %659, %v225_v30   ;;  %283 = vperm.xlu0 %658, %v224_v31  }
  0x89   :  { %637 = vmatpush3.bf16.msra.mxu0 %v636_v32 }
  0x8a   :  { %638 = vmatprep.subr.bf16.mxu0 %v858_v2 }
  0x8b   :  { %298 = vperm.xlu1 %659, %v227_v35   ;;  %293 = vperm.xlu0 %658, %v226_v36  }
  0x8d   :  { %640 = vmatpush3.bf16.msra.mxu0 %v639_v37 }
  0x8e   :  { %641 = vmatprep.subr.bf16.mxu0 %v858_v2 }
  0x8f   :  { %308 = vperm.xlu1 %659, %v229_v40   ;;  %303 = vperm.xlu0 %658, %v228_v41  }
  0x91   :  { %643 = vmatpush3.bf16.msra.mxu0 %v642_v42 }
  0x93   :  { %373 = vperm.xlu1 %659, %v350_v43   ;;  %368 = vperm.xlu0 %658, %v349_v44  }
  0x94   :  { %618 = vmatmul.mubr.f32.vlgmr.msra.gmra.mrb[0].mxu0 %v109_v45 }
  0x97   :  { %383 = vperm.xlu1 %659, %v352_v46   ;;  %378 = vperm.xlu0 %658, %v351_v47  }
  0x9b   :  { %393 = vperm.xlu1 %659, %v354_v48   ;;  %388 = vperm.xlu0 %658, %v353_v49  }
  0x9f   :  { %403 = vperm.xlu1 %659, %v356_v50   ;;  %398 = vperm.xlu0 %658, %v355_v51  }
  0xa3   :  { %413 = vperm.xlu1 %659, %v358_v52   ;;  %408 = vperm.xlu0 %658, %v357_v53  }
  0xa7   :  { %423 = vperm.xlu1 %659, %v360_v54   ;;  %418 = vperm.xlu0 %658, %v359_v55  }
  0xab   :  { %433 = vperm.xlu1 %659, %v362_v56   ;;  %428 = vperm.xlu0 %658, %v361_v57  }
  0xaf   :  { %443 = vperm.xlu1 %659, %v364_v58   ;;  %438 = vperm.xlu0 %658, %v363_v59  }
  0xf2   :  { %v244_v60 = vpop.permute.xlu1 %243  ;;  %v234_v61 = vpop.permute.xlu0 %233 }
  0xf3   :  { %v317_v17 = vmul.f32 %v1043_v12, %v234_v61  ;;  %v319_v26 = vmul.f32 %v1043_v12, %v244_v60 }
  0xf5   :  { %v333_v27 = vadd.f32 %v317_v17, %v984_v5  ;;  %v335_v42 = vadd.f32 %v319_v26, %v990_v10 }
  0xf6   :  { %v249_v62 = vpop.permute.xlu1 %248  ;;  %v239_v63 = vpop.permute.xlu0 %238 }
  0xf7   :  { %v318_v20 = vmul.f32 %v1043_v12, %v239_v63  ;;  %v320_v30 = vmul.f32 %v1043_v12, %v249_v62 }
  0xf9   :  { %v334_v31 = vadd.f32 %v318_v20, %v986_v6  ;;  %v336_v43 = vadd.f32 %v320_v30, %v992_v11 }
  0xfa   :  { %v259_v0 = vpop.permute.xlu1 %258  ;;  %v254_v1 = vpop.permute.xlu0 %253 }
  0xfb   :  { %v322_v40 = vmul.f32 %v1043_v12, %v259_v0  ;;  %v321_v41 = vmul.f32 %v1043_v12, %v254_v1 }
  0xfd   :  { %v338_v50 = vadd.f32 %v322_v40, %v998_v14  ;;  %v337_v51 = vadd.f32 %v321_v41, %v996_v13 }
  0xfe   :  { %v269_v2 = vpop.permute.xlu1 %268  ;;  %v264_v3 = vpop.permute.xlu0 %263 }
  0xff   :  { %v324_v52 = vmul.f32 %v1043_v12, %v269_v2  ;;  %v323_v10 = vmul.f32 %v1043_v12, %v264_v3 }
 0x101   :  { %v340_v13 = vadd.f32 %v324_v52, %v1005_v19  ;;  %v339_v61 = vadd.f32 %v323_v10, %v1003_v18 }
 0x102   :  { %v279_v4 = vpop.permute.xlu1 %278  ;;  %v274_v7 = vpop.permute.xlu0 %273 }
 0x103   :  { %v326_v62 = vmul.f32 %v1043_v12, %v279_v4  ;;  %v325_v63 = vmul.f32 %v1043_v12, %v274_v7 }
 0x105   :  { %v342_v18 = vadd.f32 %v326_v62, %v1012_v24  ;;  %v341_v4 = vadd.f32 %v325_v63, %v1010_v23 }
 0x106   :  { %v1039_v8 = vpop.permute.xlu1 %288  ;;  %v1041_v9 = vpop.permute.xlu0 %283 }
 0x107   :  { %v328_v7 = vmul.f32 %v1043_v12, %v1039_v8 }
 0x10a   :  { %v1045_v15 = vpop.permute.xlu1 %298  ;;  %v1047_v16 = vpop.permute.xlu0 %293 }
 0x10e   :  { %v1051_v21 = vpop.permute.xlu1 %308  ;;  %v1053_v22 = vpop.permute.xlu0 %303 }
 0x112   :  { %v374_v32 = vpop.permute.xlu1 %373  ;;  %v369_v35 = vpop.permute.xlu0 %368 }
 0x113   :  { %v453_v36 = vmul.f32 %v1055_v25, %v374_v32  ;;  %v452_v37 = vmul.f32 %v1055_v25, %v369_v35 }
 0x115   :  { %v469_v44 = vsub.f32 %v334_v31, %v453_v36  ;;  %v468_v5 = vsub.f32 %v333_v27, %v452_v37  ;;  %v327_v31 = vmul.f32 %v1043_v12, %v1041_v9 }
 0x116   :  { %v384_v45 = vpop.permute.xlu1 %383  ;;  %v379_v46 = vpop.permute.xlu0 %378 }
 0x117   :  { %v485_v47 = vmax.f32 %v469_v44, 0.0  ;;  %v484_v6 = vmax.f32 %v468_v5, 0.0  ;;  %v455_v48 = vmul.f32 %v1055_v25, %v384_v45  ;;  %v454_v49 = vmul.f32 %v1055_v25, %v379_v46 }
 0x118   :  { %v344_v44 = vadd.f32 %v328_v7, %v1019_v29  ;;  %v343_v8 = vadd.f32 %v327_v31, %v1017_v28 }
 0x119   :  { %v501_v53 = vmin.f32 %v485_v47, 1.0  ;;  %v500_v11 = vmin.f32 %v484_v6, 1.0  ;;  %v471_v54 = vsub.f32 %v336_v43, %v455_v48  ;;  %v470_v55 = vsub.f32 %v335_v42, %v454_v49 }
 0x11a   :  { %v394_v56 = vpop.permute.xlu1 %393  ;;  %v389_v57 = vpop.permute.xlu0 %388  ;;  %v330_v47 = vmul.f32 %v1043_v12, %v1045_v15  ;;  %v329_v6 = vmul.f32 %v1043_v12, %v1047_v16  ;;  %v332_v16 = vmul.f32 %v1043_v12, %v1051_v21 }
 0x11b   :  { %517 = vst [vmem:[#allocation14 + $0x8] sm:$0xff] %v501_v53  ;;  %516 = vst [vmem:[#allocation14] sm:$0xff] %v500_v11  ;;  %v487_v58 = vmax.f32 %v471_v54, 0.0  ;;  %v486_v59 = vmax.f32 %v470_v55, 0.0  ;;  %v457_v60 = vmul.f32 %v1055_v25, %v394_v56  ;;  %v456_v14 = vmul.f32 %v1055_v25, %v389_v57 }
 0x11c   :  { %v346_v54 = vadd.f32 %v330_v47, %v1026_v34  ;;  %v345_v15 = vadd.f32 %v329_v6, %v1024_v33  ;;  %v331_v55 = vmul.f32 %v1043_v12, %v1053_v22  ;;  %v348_v62 = vadd.f32 %v332_v16, %v1033_v39 }
 0x11d   :  { %v503_v0 = vmin.f32 %v487_v58, 1.0  ;;  %v502_v1 = vmin.f32 %v486_v59, 1.0  ;;  %v473_v2 = vsub.f32 %v338_v50, %v457_v60  ;;  %v472_v3 = vsub.f32 %v337_v51, %v456_v14 }
 0x11e   :  { %v404_v17 = vpop.permute.xlu1 %403  ;;  %v399_v20 = vpop.permute.xlu0 %398  ;;  %v347_v21 = vadd.f32 %v331_v55, %v1031_v38 }
 0x11f   :  { %519 = vst [vmem:[#allocation14 + $0x18] sm:$0xff] %v503_v0  ;;  %518 = vst [vmem:[#allocation14 + $0x10] sm:$0xff] %v502_v1  ;;  %v489_v26 = vmax.f32 %v473_v2, 0.0  ;;  %v488_v27 = vmax.f32 %v472_v3, 0.0  ;;  %v459_v30 = vmul.f32 %v1055_v25, %v404_v17  ;;  %v458_v19 = vmul.f32 %v1055_v25, %v399_v20 }
 0x121   :  { %v505_v32 = vmin.f32 %v489_v26, 1.0  ;;  %v504_v35 = vmin.f32 %v488_v27, 1.0  ;;  %v475_v36 = vsub.f32 %v340_v13, %v459_v30  ;;  %v474_v37 = vsub.f32 %v339_v61, %v458_v19 }
 0x122   :  { %v414_v40 = vpop.permute.xlu1 %413  ;;  %v409_v41 = vpop.permute.xlu0 %408 }
 0x123   :  { %521 = vst [vmem:[#allocation14 + $0x28] sm:$0xff] %v505_v32  ;;  %520 = vst [vmem:[#allocation14 + $0x20] sm:$0xff] %v504_v35  ;;  %v491_v42 = vmax.f32 %v475_v36, 0.0  ;;  %v490_v43 = vmax.f32 %v474_v37, 0.0  ;;  %v461_v24 = vmul.f32 %v1055_v25, %v414_v40  ;;  %v460_v23 = vmul.f32 %v1055_v25, %v409_v41 }
 0x125   :  { %v507_v5 = vmin.f32 %v491_v42, 1.0  ;;  %v506_v9 = vmin.f32 %v490_v43, 1.0  ;;  %v477_v45 = vsub.f32 %v342_v18, %v461_v24  ;;  %v476_v46 = vsub.f32 %v341_v4, %v460_v23 }
 0x126   :  { %v424_v48 = vpop.permute.xlu1 %423  ;;  %v419_v49 = vpop.permute.xlu0 %418 }
 0x127   :  { %523 = vst [vmem:[#allocation14 + $0x38] sm:$0xff] %v507_v5  ;;  %522 = vst [vmem:[#allocation14 + $0x30] sm:$0xff] %v506_v9  ;;  %v493_v50 = vmax.f32 %v477_v45, 0.0  ;;  %v492_v51 = vmax.f32 %v476_v46, 0.0  ;;  %v463_v29 = vmul.f32 %v1055_v25, %v424_v48  ;;  %v462_v28 = vmul.f32 %v1055_v25, %v419_v49 }
 0x129   :  { %v509_v52 = vmin.f32 %v493_v50, 1.0  ;;  %v508_v10 = vmin.f32 %v492_v51, 1.0  ;;  %v479_v53 = vsub.f32 %v344_v44, %v463_v29  ;;  %v478_v11 = vsub.f32 %v343_v8, %v462_v28 }
 0x12a   :  { %v434_v56 = vpop.permute.xlu1 %433  ;;  %v429_v57 = vpop.permute.xlu0 %428 }
 0x12b   :  { %525 = vst [vmem:[#allocation14 + $0x48] sm:$0xff] %v509_v52  ;;  %524 = vst [vmem:[#allocation14 + $0x40] sm:$0xff] %v508_v10  ;;  %v495_v58 = vmax.f32 %v479_v53, 0.0  ;;  %v494_v59 = vmax.f32 %v478_v11, 0.0  ;;  %v465_v60 = vmul.f32 %v1055_v25, %v434_v56  ;;  %v464_v14 = vmul.f32 %v1055_v25, %v429_v57 }
 0x12d   :  { %v511_v13 = vmin.f32 %v495_v58, 1.0  ;;  %v510_v34 = vmin.f32 %v494_v59, 1.0  ;;  %v481_v61 = vsub.f32 %v346_v54, %v465_v60  ;;  %v480_v33 = vsub.f32 %v345_v15, %v464_v14 }
 0x12e   :  { %v444_v63 = vpop.permute.xlu1 %443  ;;  %v439_v12 = vpop.permute.xlu0 %438 }
 0x12f   :  { %527 = vst [vmem:[#allocation14 + $0x58] sm:$0xff] %v511_v13  ;;  %526 = vst [vmem:[#allocation14 + $0x50] sm:$0xff] %v510_v34  ;;  %v497_v22 = vmax.f32 %v481_v61, 0.0  ;;  %v496_v0 = vmax.f32 %v480_v33, 0.0  ;;  %v467_v1 = vmul.f32 %v1055_v25, %v444_v63  ;;  %v466_v2 = vmul.f32 %v1055_v25, %v439_v12 }
 0x131   :  { %v513_v3 = vmin.f32 %v497_v22, 1.0  ;;  %v512_v17 = vmin.f32 %v496_v0, 1.0  ;;  %v483_v20 = vsub.f32 %v348_v62, %v467_v1  ;;  %v482_v26 = vsub.f32 %v347_v21, %v466_v2 }
 0x133   :  { %529 = vst [vmem:[#allocation14 + $0x68] sm:$0xff] %v513_v3  ;;  %528 = vst [vmem:[#allocation14 + $0x60] sm:$0xff] %v512_v17  ;;  %v499_v39 = vmax.f32 %v483_v20, 0.0  ;;  %v498_v38 = vmax.f32 %v482_v26, 0.0 }
 0x135   :  { %v515_v27 = vmin.f32 %v499_v39, 1.0  ;;  %v514_v30 = vmin.f32 %v498_v38, 1.0 }
 0x137   :  { %531 = vst [vmem:[#allocation14 + $0x78] sm:$0xff] %v515_v27  ;;  %530 = vst [vmem:[#allocation14 + $0x70] sm:$0xff] %v514_v30 }
 0x138   :  { %803 = shalt.err (!%p800_p10)
}
 0x139   :  { %s804_s8 = scalar_lea.hbm %s1143_s7, 2048 }
 0x13a   :  { %p805_p11 = scmp.ne.s32.totalorder %s1143_s7, %s804_s8  ;;  %p808_p12 = scmp.lt.u32.totalorder %s804_s8, %s1143_s7 }
 0x13c   :  { %p810_p13 = pnand %p808_p12, %p805_p11 }
 0x13e   :  { %813 = shalt.err (!%p810_p13)
}
 0x13f   :  { %553 = dma.vmem_to_hbm [thread:$0]  %s548_s0, 2048, %s1143_s7, [#allocation15], %s849_s11, %s849_s11, %s850_s12   ;;  %v108_v25 = vld [vmem:[#allocation13] sm:$0x1] }
 0x140   :  { %s861_s2 = smov [#allocation13]  }
 0x141   :  { %s538_s3 = sshll.u32 %s861_s2, 4  ;;  %s539_s3 = int_to_ptr.vmem [resolvable:$true] %s538_s3 }
 0x142   :  { %s814_s16 = scalar_lea.vmem %s539_s3, 16  ;;  %s818_s19 = scalar_lea.vmem %s539_s3, 32 }
 0x143   :  { %p815_p0 = scmp.ne.s32.totalorder %s539_s3, %s814_s16  ;;  %p819_p1 = scmp.lt.s32.totalorder %s539_s3, %s539_s3 }
 0x144   :  { %p820_p2 = scmp.lt.s32.totalorder %s818_s19, %s814_s16 }
 0x146   :  { %p821_p3 = por %p820_p2, %p819_p1 }
 0x148   :  { %p822_p4 = pnand %p821_p3, %p815_p0 }
 0x167   :  { %v192_v19 = vpop.f32.mrb[0].mxu0 }
 0x168   :  { %v196_v18 = vadd.f32 %v192_v19, %v108_v25  ;;  %v619_v4 = vpop.f32.mrb[1].mxu0 }
 0x16a   :  { %197 = vst [vmem:[#allocation13] sm:$0x1] %v196_v18 }
 0x16b   :  { %825 = shalt.err (!%p822_p4)
}
 0x16c   :  { %s826_s7 = scalar_lea.hbm %s1142_s6, 16 }
 0x16d   :  { %p827_p5 = scmp.ne.s32.totalorder %s1142_s6, %s826_s7  ;;  %p830_p6 = scmp.lt.u32.totalorder %s826_s7, %s1142_s6 }
 0x16f   :  { %p832_p7 = pnand %p830_p6, %p827_p5 }
 0x171   :  { %835 = shalt.err (!%p832_p7)
}
 0x172   :  { %541 = dma.vmem_to_hbm [thread:$0]  %s539_s3, 16, %s1142_s6, [#allocation4]  }
 0x173   :  { %844 = dma.done.wait [#allocation4], 16  }
 0x174   :  { %845 = vsyncadd [#allocation4], 4294967280 }
 0x175   :  { %846 = dma.done.wait [#allocation15], 2048  }
 0x176   :  { %847 = vsyncadd [#allocation15], 4294965248 }
 0x177   :  { %560 = vsyncpa [#allocation3], 1 }
 0x178   :  { %561 = vsyncpa [#allocation6], 1 }
 0x179   :  { %562 = vsyncpa [#allocation9], 1 }
 0x17a   :  { %563 = vsyncpa [#allocation12], 1 }
 0x17b   :  { %564 = vsyncpa [#allocation4], 1 }
 0x17c   :  { %565 = vsyncpa [#allocation15], 1 }

</bundles_post_ra>
